<compile_context>
chip_gen: v6e
topology: v6e:2x2x1
jax: 0.10.0
libtpu: 0.0.40
codegen_flags: <defaults>
</compile_context>

<pallas_src>
import functools

import jax
import jax.numpy as jnp
from jax import lax
from jax.experimental import pallas as pl
from jax.experimental.pallas import tpu as pltpu


def lstm_classifier_kernel(x_ref, wih_ref, whh_ref, b_ref, wcls_ref, bcls_ref,
                           out_ref, *, seq_len, batch):
    """Single-layer LSTM over the full sequence + Linear on the last hidden state.

    x_ref    : (B*T, F)  batch-major flattened input (row b*T + t), f32
    wih_ref  : (F, 4H)   W_ih^T, gate order [i, f, g, o], f32
    whh_ref  : (H, 4H)   W_hh^T, gate order [i, f, g, o], bf16 (MXU operand)
    b_ref    : (1, 4H)   bias_ih + bias_hh, f32
    wcls_ref : (O, H)    classifier weight (PyTorch layout), f32
    bcls_ref : (1, O)    classifier bias, f32
    out_ref  : (B, O)
    """
    B, T = batch, seq_len
    H = whh_ref.shape[0]
    O = out_ref.shape[1]

    # -------- Preamble (off the recurrence critical chain) -------------------
    # All timesteps' input projections in one MXU matmul, bias folded in.
    proj = (jnp.dot(x_ref[...], wih_ref[...], preferred_element_type=jnp.float32)
            + b_ref[...])                                   # (B*T, 4H) batch-major
    # Layout-preserving reshape: (B*T, 4H) -> (B, T, 4H); static slices below.
    projs = proj.reshape(B, T, 4 * H)

    whh = whh_ref[...]                                       # (H, 4H) bf16, hoisted load

    h = jnp.zeros((B, H), jnp.float32)
    c = jnp.zeros((B, H), jnp.float32)

    # -------- Recurrence: one fused 128-lane-wide matmul + 2 EUP pushes/step --
    # T is small and static; a Python loop keeps every index static. For large T
    # switch to lax.fori_loop(..., unroll=<bounded>) to cap code size / vreg pressure.
    for t in range(T):
        xg_t = projs[:, t, :]                                # (B, 4H), static slice
        pre = xg_t + jnp.dot(h.astype(jnp.bfloat16), whh,
                             preferred_element_type=jnp.float32)   # (B, 4H), one MXU push
        sig = jax.nn.sigmoid(pre)                            # full-width EUP push
        tnh = jnp.tanh(pre)                                  # full-width EUP push
        i_g = sig[:, 0 * H:1 * H]
        f_g = sig[:, 1 * H:2 * H]
        g_g = tnh[:, 2 * H:3 * H]
        o_g = sig[:, 3 * H:4 * H]
        c = f_g * c + i_g * g_g
        h = o_g * jnp.tanh(c)

    # -------- Classifier on the last hidden state -----------------------------
    if O == 1:
        # (B,H)x(H,1) would waste the MXU; VPU multiply + lane reduction instead.
        out_ref[...] = (jnp.sum(h * wcls_ref[...], axis=1, keepdims=True)
                        + bcls_ref[...])
    else:
        out_ref[...] = (lax.dot_general(h, wcls_ref[...],
                                        (((1,), (1,)), ((), ())),
                                        preferred_element_type=jnp.float32)
                        + bcls_ref[...])


def prepare_params(params):
    """One-time conversion of PyTorch-layout weights to kernel-ready layout."""
    H4 = params["w_ih"].shape[0]
    H = H4 // 4
    return {
        "wih_t": jnp.transpose(params["w_ih"]).astype(jnp.float32),      # (F, 4H)
        # Recurrent weights as a single fused (H, 4H) matrix, bf16 for the MXU.
        "whh_t": jnp.transpose(params["w_hh"]).astype(jnp.bfloat16),     # (H, 4H)
        "bias": (params["b_ih"] + params["b_hh"]).reshape(1, 4 * H).astype(jnp.float32),
        "w_cls": params["w_cls"].astype(jnp.float32),                    # (O, H)
        "b_cls": params["b_cls"].reshape(1, -1).astype(jnp.float32),     # (1, O)
    }


@jax.jit
def square_model_lstm_forward(x_btf, prep):
    """x_btf: (B, T, F) float32 batch-first (like PyTorch). Returns (B, n_outputs)."""
    B, T, F = x_btf.shape
    O = prep["w_cls"].shape[0]

    # Free reshape (no transpose, no extra HBM round trip of x).
    x2d = x_btf.reshape(B * T, F)

    vmem = pl.BlockSpec(memory_space=pltpu.MemorySpace.VMEM)
    kernel = functools.partial(lstm_classifier_kernel, seq_len=T, batch=B)

    out = pl.pallas_call(
        kernel,
        out_shape=jax.ShapeDtypeStruct((B, O), jnp.float32),
        in_specs=[vmem] * 6,
        out_specs=vmem,
    )(x2d, prep["wih_t"], prep["whh_t"], prep["bias"], prep["w_cls"], prep["b_cls"])
    return out.reshape(-1, O)


def reference_forward(x_btf, params):
    """Pure-JAX f32 reference mirroring nn.LSTM(batch_first=True) + nn.Linear."""
    H = params["w_hh"].shape[1]
    w_ih, w_hh = params["w_ih"], params["w_hh"]
    b = params["b_ih"] + params["b_hh"]

    def step(carry, x_t):
        h, c = carry
        gates = x_t @ w_ih.T + h @ w_hh.T + b
        i = jax.nn.sigmoid(gates[:, 0 * H:1 * H])
        f = jax.nn.sigmoid(gates[:, 1 * H:2 * H])
        g = jnp.tanh(gates[:, 2 * H:3 * H])
        o = jax.nn.sigmoid(gates[:, 3 * H:4 * H])
        c = f * c + i * g
        h = o * jnp.tanh(c)
        return (h, c), None

    B = x_btf.shape[0]
    h0 = jnp.zeros((B, H), jnp.float32)
    c0 = jnp.zeros((B, H), jnp.float32)
    (h_last, _), _ = lax.scan(step, (h0, c0), jnp.transpose(x_btf, (1, 0, 2)))
    out = h_last @ params["w_cls"].T + params["b_cls"]
    return out.reshape(-1, params["w_cls"].shape[0])


if __name__ == "__main__":
    # SquareModelLSTM(n_features=4, hidden_dim=32, n_outputs=1)
    n_features, hidden_dim, n_outputs = 4, 32, 1
    batch, seq = 2, 8

    key = jax.random.PRNGKey(0)
    ks = jax.random.split(key, 8)
    bound = 1.0 / jnp.sqrt(hidden_dim)  # PyTorch LSTM/Linear uniform init scale

    params = {
        "w_ih":  jax.random.uniform(ks[0], (4 * hidden_dim, n_features), jnp.float32, -bound, bound),
        "w_hh":  jax.random.uniform(ks[1], (4 * hidden_dim, hidden_dim), jnp.float32, -bound, bound),
        "b_ih":  jax.random.uniform(ks[2], (4 * hidden_dim,), jnp.float32, -bound, bound),
        "b_hh":  jax.random.uniform(ks[3], (4 * hidden_dim,), jnp.float32, -bound, bound),
        "w_cls": jax.random.uniform(ks[4], (n_outputs, hidden_dim), jnp.float32, -bound, bound),
        "b_cls": jax.random.uniform(ks[5], (n_outputs,), jnp.float32, -bound, bound),
    }

    x = jax.random.normal(ks[6], (batch, seq, n_features), jnp.float32)

    prep = prepare_params(params)            # one-time weight prep (not per forward call)
    out = square_model_lstm_forward(x, prep)
    out = jax.block_until_ready(out)

    ref = reference_forward(x, params)
    assert out.shape == (batch, n_outputs), out.shape
    # Tolerance relaxed vs. the pure-f32 version: the recurrent matmul runs with
    # bf16 operands (f32 accumulation); observed/expected deviation is <~1e-2.
    assert jnp.allclose(out, ref, rtol=2e-2, atol=2e-2), (out, ref)

    print("KERNEL_OK")
</pallas_src>

<mosaic_0001>
module attributes {stable_mosaic.version = 11 : i64} {
  func.func @lstm_classifier_kernel(%arg0: memref<16x4xf32, #tpu.memory_space<vmem>>, %arg1: memref<4x128xf32, #tpu.memory_space<vmem>>, %arg2: memref<32x128xbf16, #tpu.memory_space<vmem>>, %arg3: memref<1x128xf32, #tpu.memory_space<vmem>>, %arg4: memref<1x32xf32, #tpu.memory_space<vmem>>, %arg5: memref<1x1xf32, #tpu.memory_space<vmem>>, %arg6: memref<2x1xf32, #tpu.memory_space<vmem>>) attributes {dimension_semantics = [], scalar_prefetch = 0 : i64, scratch_operands = 0 : i64, tpu.core_type = #tpu.core_type<tc>} {
    %c0 = arith.constant 0 : index
    %c0_0 = arith.constant 0 : index
    %0 = vector.load %arg0[%c0, %c0_0] : memref<16x4xf32, #tpu.memory_space<vmem>>, vector<16x4xf32>
    %c0_1 = arith.constant 0 : index
    %c0_2 = arith.constant 0 : index
    %1 = vector.load %arg1[%c0_1, %c0_2] : memref<4x128xf32, #tpu.memory_space<vmem>>, vector<4x128xf32>
    %cst = arith.constant dense<0.000000e+00> : vector<16x128xf32>
    %2 = tpu.matmul %0, %1, %cst {dimension_numbers = #tpu.dot_dimension_numbers<[1], [0], [0], [1], [0, 0, 1, 1], [], []>} : vector<16x4xf32>, vector<4x128xf32>, vector<16x128xf32> -> vector<16x128xf32>
    %c0_3 = arith.constant 0 : index
    %c0_4 = arith.constant 0 : index
    %3 = vector.load %arg3[%c0_3, %c0_4] : memref<1x128xf32, #tpu.memory_space<vmem>>, vector<1x128xf32>
    %4 = vector.broadcast %3 : vector<1x128xf32> to vector<16x128xf32>
    %5 = arith.addf %2, %4 : vector<16x128xf32>
    %6 = vector.shape_cast %5 : vector<16x128xf32> to vector<2x8x128xf32>
    %c0_5 = arith.constant 0 : index
    %c0_6 = arith.constant 0 : index
    %7 = vector.load %arg2[%c0_5, %c0_6] : memref<32x128xbf16, #tpu.memory_space<vmem>>, vector<32x128xbf16>
    %cst_7 = arith.constant 0.000000e+00 : f32
    %8 = vector.broadcast %cst_7 : f32 to vector<2x32xf32>
    %cst_8 = arith.constant 0.000000e+00 : f32
    %9 = vector.broadcast %cst_8 : f32 to vector<2x32xf32>
    %10 = vector.extract_strided_slice %6 {offsets = [0, 0, 0], sizes = [2, 1, 128], strides = [1, 1, 1]} : vector<2x8x128xf32> to vector<2x1x128xf32>
    %11 = vector.shape_cast %10 : vector<2x1x128xf32> to vector<2x128xf32>
    %12 = arith.truncf %8 : vector<2x32xf32> to vector<2x32xbf16>
    %cst_9 = arith.constant dense<0.000000e+00> : vector<2x128xf32>
    %13 = tpu.matmul %12, %7, %cst_9 {dimension_numbers = #tpu.dot_dimension_numbers<[1], [0], [0], [1], [0, 0, 1, 1], [], []>} : vector<2x32xbf16>, vector<32x128xbf16>, vector<2x128xf32> -> vector<2x128xf32>
    %14 = arith.addf %11, %13 : vector<2x128xf32>
    %15 = arith.negf %14 : vector<2x128xf32>
    %16 = math.exp %15 : vector<2x128xf32>
    %cst_10 = arith.constant 1.000000e+00 : f32
    %17 = vector.broadcast %cst_10 : f32 to vector<2x128xf32>
    %18 = arith.addf %17, %16 : vector<2x128xf32>
    %19 = arith.divf %17, %18 : vector<2x128xf32>
    %20 = math.tanh %14 : vector<2x128xf32>
    %21 = vector.extract_strided_slice %19 {offsets = [0, 0], sizes = [2, 32], strides = [1, 1]} : vector<2x128xf32> to vector<2x32xf32>
    %22 = vector.extract_strided_slice %19 {offsets = [0, 32], sizes = [2, 32], strides = [1, 1]} : vector<2x128xf32> to vector<2x32xf32>
    %23 = vector.extract_strided_slice %20 {offsets = [0, 64], sizes = [2, 32], strides = [1, 1]} : vector<2x128xf32> to vector<2x32xf32>
    %24 = vector.extract_strided_slice %19 {offsets = [0, 96], sizes = [2, 32], strides = [1, 1]} : vector<2x128xf32> to vector<2x32xf32>
    %25 = arith.mulf %22, %9 : vector<2x32xf32>
    %26 = arith.mulf %21, %23 : vector<2x32xf32>
    %27 = arith.addf %25, %26 : vector<2x32xf32>
    %28 = math.tanh %27 : vector<2x32xf32>
    %29 = arith.mulf %24, %28 : vector<2x32xf32>
    %30 = vector.extract_strided_slice %6 {offsets = [0, 1, 0], sizes = [2, 1, 128], strides = [1, 1, 1]} : vector<2x8x128xf32> to vector<2x1x128xf32>
    %31 = vector.shape_cast %30 : vector<2x1x128xf32> to vector<2x128xf32>
    %32 = arith.truncf %29 : vector<2x32xf32> to vector<2x32xbf16>
    %cst_11 = arith.constant dense<0.000000e+00> : vector<2x128xf32>
    %33 = tpu.matmul %32, %7, %cst_11 {dimension_numbers = #tpu.dot_dimension_numbers<[1], [0], [0], [1], [0, 0, 1, 1], [], []>} : vector<2x32xbf16>, vector<32x128xbf16>, vector<2x128xf32> -> vector<2x128xf32>
    %34 = arith.addf %31, %33 : vector<2x128xf32>
    %35 = arith.negf %34 : vector<2x128xf32>
    %36 = math.exp %35 : vector<2x128xf32>
    %cst_12 = arith.constant 1.000000e+00 : f32
    %37 = vector.broadcast %cst_12 : f32 to vector<2x128xf32>
    %38 = arith.addf %37, %36 : vector<2x128xf32>
    %39 = arith.divf %37, %38 : vector<2x128xf32>
    %40 = math.tanh %34 : vector<2x128xf32>
    %41 = vector.extract_strided_slice %39 {offsets = [0, 0], sizes = [2, 32], strides = [1, 1]} : vector<2x128xf32> to vector<2x32xf32>
    %42 = vector.extract_strided_slice %39 {offsets = [0, 32], sizes = [2, 32], strides = [1, 1]} : vector<2x128xf32> to vector<2x32xf32>
    %43 = vector.extract_strided_slice %40 {offsets = [0, 64], sizes = [2, 32], strides = [1, 1]} : vector<2x128xf32> to vector<2x32xf32>
    %44 = vector.extract_strided_slice %39 {offsets = [0, 96], sizes = [2, 32], strides = [1, 1]} : vector<2x128xf32> to vector<2x32xf32>
    %45 = arith.mulf %42, %27 : vector<2x32xf32>
    %46 = arith.mulf %41, %43 : vector<2x32xf32>
    %47 = arith.addf %45, %46 : vector<2x32xf32>
    %48 = math.tanh %47 : vector<2x32xf32>
    %49 = arith.mulf %44, %48 : vector<2x32xf32>
    %50 = vector.extract_strided_slice %6 {offsets = [0, 2, 0], sizes = [2, 1, 128], strides = [1, 1, 1]} : vector<2x8x128xf32> to vector<2x1x128xf32>
    %51 = vector.shape_cast %50 : vector<2x1x128xf32> to vector<2x128xf32>
    %52 = arith.truncf %49 : vector<2x32xf32> to vector<2x32xbf16>
    %cst_13 = arith.constant dense<0.000000e+00> : vector<2x128xf32>
    %53 = tpu.matmul %52, %7, %cst_13 {dimension_numbers = #tpu.dot_dimension_numbers<[1], [0], [0], [1], [0, 0, 1, 1], [], []>} : vector<2x32xbf16>, vector<32x128xbf16>, vector<2x128xf32> -> vector<2x128xf32>
    %54 = arith.addf %51, %53 : vector<2x128xf32>
    %55 = arith.negf %54 : vector<2x128xf32>
    %56 = math.exp %55 : vector<2x128xf32>
    %cst_14 = arith.constant 1.000000e+00 : f32
    %57 = vector.broadcast %cst_14 : f32 to vector<2x128xf32>
    %58 = arith.addf %57, %56 : vector<2x128xf32>
    %59 = arith.divf %57, %58 : vector<2x128xf32>
    %60 = math.tanh %54 : vector<2x128xf32>
    %61 = vector.extract_strided_slice %59 {offsets = [0, 0], sizes = [2, 32], strides = [1, 1]} : vector<2x128xf32> to vector<2x32xf32>
    %62 = vector.extract_strided_slice %59 {offsets = [0, 32], sizes = [2, 32], strides = [1, 1]} : vector<2x128xf32> to vector<2x32xf32>
    %63 = vector.extract_strided_slice %60 {offsets = [0, 64], sizes = [2, 32], strides = [1, 1]} : vector<2x128xf32> to vector<2x32xf32>
    %64 = vector.extract_strided_slice %59 {offsets = [0, 96], sizes = [2, 32], strides = [1, 1]} : vector<2x128xf32> to vector<2x32xf32>
    %65 = arith.mulf %62, %47 : vector<2x32xf32>
    %66 = arith.mulf %61, %63 : vector<2x32xf32>
    %67 = arith.addf %65, %66 : vector<2x32xf32>
    %68 = math.tanh %67 : vector<2x32xf32>
    %69 = arith.mulf %64, %68 : vector<2x32xf32>
    %70 = vector.extract_strided_slice %6 {offsets = [0, 3, 0], sizes = [2, 1, 128], strides = [1, 1, 1]} : vector<2x8x128xf32> to vector<2x1x128xf32>
    %71 = vector.shape_cast %70 : vector<2x1x128xf32> to vector<2x128xf32>
    %72 = arith.truncf %69 : vector<2x32xf32> to vector<2x32xbf16>
    %cst_15 = arith.constant dense<0.000000e+00> : vector<2x128xf32>
    %73 = tpu.matmul %72, %7, %cst_15 {dimension_numbers = #tpu.dot_dimension_numbers<[1], [0], [0], [1], [0, 0, 1, 1], [], []>} : vector<2x32xbf16>, vector<32x128xbf16>, vector<2x128xf32> -> vector<2x128xf32>
    %74 = arith.addf %71, %73 : vector<2x128xf32>
    %75 = arith.negf %74 : vector<2x128xf32>
    %76 = math.exp %75 : vector<2x128xf32>
    %cst_16 = arith.constant 1.000000e+00 : f32
    %77 = vector.broadcast %cst_16 : f32 to vector<2x128xf32>
    %78 = arith.addf %77, %76 : vector<2x128xf32>
    %79 = arith.divf %77, %78 : vector<2x128xf32>
    %80 = math.tanh %74 : vector<2x128xf32>
    %81 = vector.extract_strided_slice %79 {offsets = [0, 0], sizes = [2, 32], strides = [1, 1]} : vector<2x128xf32> to vector<2x32xf32>
    %82 = vector.extract_strided_slice %79 {offsets = [0, 32], sizes = [2, 32], strides = [1, 1]} : vector<2x128xf32> to vector<2x32xf32>
    %83 = vector.extract_strided_slice %80 {offsets = [0, 64], sizes = [2, 32], strides = [1, 1]} : vector<2x128xf32> to vector<2x32xf32>
    %84 = vector.extract_strided_slice %79 {offsets = [0, 96], sizes = [2, 32], strides = [1, 1]} : vector<2x128xf32> to vector<2x32xf32>
    %85 = arith.mulf %82, %67 : vector<2x32xf32>
    %86 = arith.mulf %81, %83 : vector<2x32xf32>
    %87 = arith.addf %85, %86 : vector<2x32xf32>
    %88 = math.tanh %87 : vector<2x32xf32>
    %89 = arith.mulf %84, %88 : vector<2x32xf32>
    %90 = vector.extract_strided_slice %6 {offsets = [0, 4, 0], sizes = [2, 1, 128], strides = [1, 1, 1]} : vector<2x8x128xf32> to vector<2x1x128xf32>
    %91 = vector.shape_cast %90 : vector<2x1x128xf32> to vector<2x128xf32>
    %92 = arith.truncf %89 : vector<2x32xf32> to vector<2x32xbf16>
    %cst_17 = arith.constant dense<0.000000e+00> : vector<2x128xf32>
    %93 = tpu.matmul %92, %7, %cst_17 {dimension_numbers = #tpu.dot_dimension_numbers<[1], [0], [0], [1], [0, 0, 1, 1], [], []>} : vector<2x32xbf16>, vector<32x128xbf16>, vector<2x128xf32> -> vector<2x128xf32>
    %94 = arith.addf %91, %93 : vector<2x128xf32>
    %95 = arith.negf %94 : vector<2x128xf32>
    %96 = math.exp %95 : vector<2x128xf32>
    %cst_18 = arith.constant 1.000000e+00 : f32
    %97 = vector.broadcast %cst_18 : f32 to vector<2x128xf32>
    %98 = arith.addf %97, %96 : vector<2x128xf32>
    %99 = arith.divf %97, %98 : vector<2x128xf32>
    %100 = math.tanh %94 : vector<2x128xf32>
    %101 = vector.extract_strided_slice %99 {offsets = [0, 0], sizes = [2, 32], strides = [1, 1]} : vector<2x128xf32> to vector<2x32xf32>
    %102 = vector.extract_strided_slice %99 {offsets = [0, 32], sizes = [2, 32], strides = [1, 1]} : vector<2x128xf32> to vector<2x32xf32>
    %103 = vector.extract_strided_slice %100 {offsets = [0, 64], sizes = [2, 32], strides = [1, 1]} : vector<2x128xf32> to vector<2x32xf32>
    %104 = vector.extract_strided_slice %99 {offsets = [0, 96], sizes = [2, 32], strides = [1, 1]} : vector<2x128xf32> to vector<2x32xf32>
    %105 = arith.mulf %102, %87 : vector<2x32xf32>
    %106 = arith.mulf %101, %103 : vector<2x32xf32>
    %107 = arith.addf %105, %106 : vector<2x32xf32>
    %108 = math.tanh %107 : vector<2x32xf32>
    %109 = arith.mulf %104, %108 : vector<2x32xf32>
    %110 = vector.extract_strided_slice %6 {offsets = [0, 5, 0], sizes = [2, 1, 128], strides = [1, 1, 1]} : vector<2x8x128xf32> to vector<2x1x128xf32>
    %111 = vector.shape_cast %110 : vector<2x1x128xf32> to vector<2x128xf32>
    %112 = arith.truncf %109 : vector<2x32xf32> to vector<2x32xbf16>
    %cst_19 = arith.constant dense<0.000000e+00> : vector<2x128xf32>
    %113 = tpu.matmul %112, %7, %cst_19 {dimension_numbers = #tpu.dot_dimension_numbers<[1], [0], [0], [1], [0, 0, 1, 1], [], []>} : vector<2x32xbf16>, vector<32x128xbf16>, vector<2x128xf32> -> vector<2x128xf32>
    %114 = arith.addf %111, %113 : vector<2x128xf32>
    %115 = arith.negf %114 : vector<2x128xf32>
    %116 = math.exp %115 : vector<2x128xf32>
    %cst_20 = arith.constant 1.000000e+00 : f32
    %117 = vector.broadcast %cst_20 : f32 to vector<2x128xf32>
    %118 = arith.addf %117, %116 : vector<2x128xf32>
    %119 = arith.divf %117, %118 : vector<2x128xf32>
    %120 = math.tanh %114 : vector<2x128xf32>
    %121 = vector.extract_strided_slice %119 {offsets = [0, 0], sizes = [2, 32], strides = [1, 1]} : vector<2x128xf32> to vector<2x32xf32>
    %122 = vector.extract_strided_slice %119 {offsets = [0, 32], sizes = [2, 32], strides = [1, 1]} : vector<2x128xf32> to vector<2x32xf32>
    %123 = vector.extract_strided_slice %120 {offsets = [0, 64], sizes = [2, 32], strides = [1, 1]} : vector<2x128xf32> to vector<2x32xf32>
    %124 = vector.extract_strided_slice %119 {offsets = [0, 96], sizes = [2, 32], strides = [1, 1]} : vector<2x128xf32> to vector<2x32xf32>
    %125 = arith.mulf %122, %107 : vector<2x32xf32>
    %126 = arith.mulf %121, %123 : vector<2x32xf32>
    %127 = arith.addf %125, %126 : vector<2x32xf32>
    %128 = math.tanh %127 : vector<2x32xf32>
    %129 = arith.mulf %124, %128 : vector<2x32xf32>
    %130 = vector.extract_strided_slice %6 {offsets = [0, 6, 0], sizes = [2, 1, 128], strides = [1, 1, 1]} : vector<2x8x128xf32> to vector<2x1x128xf32>
    %131 = vector.shape_cast %130 : vector<2x1x128xf32> to vector<2x128xf32>
    %132 = arith.truncf %129 : vector<2x32xf32> to vector<2x32xbf16>
    %cst_21 = arith.constant dense<0.000000e+00> : vector<2x128xf32>
    %133 = tpu.matmul %132, %7, %cst_21 {dimension_numbers = #tpu.dot_dimension_numbers<[1], [0], [0], [1], [0, 0, 1, 1], [], []>} : vector<2x32xbf16>, vector<32x128xbf16>, vector<2x128xf32> -> vector<2x128xf32>
    %134 = arith.addf %131, %133 : vector<2x128xf32>
    %135 = arith.negf %134 : vector<2x128xf32>
    %136 = math.exp %135 : vector<2x128xf32>
    %cst_22 = arith.constant 1.000000e+00 : f32
    %137 = vector.broadcast %cst_22 : f32 to vector<2x128xf32>
    %138 = arith.addf %137, %136 : vector<2x128xf32>
    %139 = arith.divf %137, %138 : vector<2x128xf32>
    %140 = math.tanh %134 : vector<2x128xf32>
    %141 = vector.extract_strided_slice %139 {offsets = [0, 0], sizes = [2, 32], strides = [1, 1]} : vector<2x128xf32> to vector<2x32xf32>
    %142 = vector.extract_strided_slice %139 {offsets = [0, 32], sizes = [2, 32], strides = [1, 1]} : vector<2x128xf32> to vector<2x32xf32>
    %143 = vector.extract_strided_slice %140 {offsets = [0, 64], sizes = [2, 32], strides = [1, 1]} : vector<2x128xf32> to vector<2x32xf32>
    %144 = vector.extract_strided_slice %139 {offsets = [0, 96], sizes = [2, 32], strides = [1, 1]} : vector<2x128xf32> to vector<2x32xf32>
    %145 = arith.mulf %142, %127 : vector<2x32xf32>
    %146 = arith.mulf %141, %143 : vector<2x32xf32>
    %147 = arith.addf %145, %146 : vector<2x32xf32>
    %148 = math.tanh %147 : vector<2x32xf32>
    %149 = arith.mulf %144, %148 : vector<2x32xf32>
    %150 = vector.extract_strided_slice %6 {offsets = [0, 7, 0], sizes = [2, 1, 128], strides = [1, 1, 1]} : vector<2x8x128xf32> to vector<2x1x128xf32>
    %151 = vector.shape_cast %150 : vector<2x1x128xf32> to vector<2x128xf32>
    %152 = arith.truncf %149 : vector<2x32xf32> to vector<2x32xbf16>
    %cst_23 = arith.constant dense<0.000000e+00> : vector<2x128xf32>
    %153 = tpu.matmul %152, %7, %cst_23 {dimension_numbers = #tpu.dot_dimension_numbers<[1], [0], [0], [1], [0, 0, 1, 1], [], []>} : vector<2x32xbf16>, vector<32x128xbf16>, vector<2x128xf32> -> vector<2x128xf32>
    %154 = arith.addf %151, %153 : vector<2x128xf32>
    %155 = arith.negf %154 : vector<2x128xf32>
    %156 = math.exp %155 : vector<2x128xf32>
    %cst_24 = arith.constant 1.000000e+00 : f32
    %157 = vector.broadcast %cst_24 : f32 to vector<2x128xf32>
    %158 = arith.addf %157, %156 : vector<2x128xf32>
    %159 = arith.divf %157, %158 : vector<2x128xf32>
    %160 = math.tanh %154 : vector<2x128xf32>
    %161 = vector.extract_strided_slice %159 {offsets = [0, 0], sizes = [2, 32], strides = [1, 1]} : vector<2x128xf32> to vector<2x32xf32>
    %162 = vector.extract_strided_slice %159 {offsets = [0, 32], sizes = [2, 32], strides = [1, 1]} : vector<2x128xf32> to vector<2x32xf32>
    %163 = vector.extract_strided_slice %160 {offsets = [0, 64], sizes = [2, 32], strides = [1, 1]} : vector<2x128xf32> to vector<2x32xf32>
    %164 = vector.extract_strided_slice %159 {offsets = [0, 96], sizes = [2, 32], strides = [1, 1]} : vector<2x128xf32> to vector<2x32xf32>
    %165 = arith.mulf %162, %147 : vector<2x32xf32>
    %166 = arith.mulf %161, %163 : vector<2x32xf32>
    %167 = arith.addf %165, %166 : vector<2x32xf32>
    %168 = math.tanh %167 : vector<2x32xf32>
    %169 = arith.mulf %164, %168 : vector<2x32xf32>
    %c0_25 = arith.constant 0 : index
    %c0_26 = arith.constant 0 : index
    %170 = vector.load %arg4[%c0_25, %c0_26] : memref<1x32xf32, #tpu.memory_space<vmem>>, vector<1x32xf32>
    %171 = vector.broadcast %170 : vector<1x32xf32> to vector<2x32xf32>
    %172 = arith.mulf %169, %171 : vector<2x32xf32>
    %cst_27 = arith.constant dense<0.000000e+00> : vector<2xf32>
    %173 = vector.multi_reduction <add>, %172, %cst_27 [1] : vector<2x32xf32> to vector<2xf32>
    %174 = vector.shape_cast %173 : vector<2xf32> to vector<2x1xf32>
    %c0_28 = arith.constant 0 : index
    %c0_29 = arith.constant 0 : index
    %175 = vector.load %arg5[%c0_28, %c0_29] : memref<1x1xf32, #tpu.memory_space<vmem>>, vector<1x1xf32>
    %176 = vector.broadcast %175 : vector<1x1xf32> to vector<2x1xf32>
    %177 = arith.addf %174, %176 : vector<2x1xf32>
    %c0_30 = arith.constant 0 : index
    %c0_31 = arith.constant 0 : index
    %178 = vector.load %arg6[%c0_30, %c0_31] : memref<2x1xf32, #tpu.memory_space<vmem>>, vector<2x1xf32>
    tpu.vector_store %arg6[%c0_30, %c0_31], %177 {strides = array<i32>} : memref<2x1xf32, #tpu.memory_space<vmem>>, vector<2x1xf32>,
    return
  }
}

</mosaic_0001>

<bundles_post_ra>
// kernel: square_model_lstm_forward.1
= control target key start
LH: loop header
LB: loop body
LE: loop exit
PB: predicated region body
PF: predicated region fallthrough
CT: control target
= control target key end

     0   :  { %vm43_vm0 = vcmask 1043456   ;;  %v1354_v0 = vmov 0.0   ;;  %vm36_vm1 = vcmask 31744   ;;  %vm1355_vm2 = vmmov 0   ;;  %s1359_s9 = smov 96   ;;  %s1588_s2 = inlined_call_operand.vmem [shape: bf16[32,128], index: 2, kind: input, shape index: {}]   ;;  %s1589_s1 = inlined_call_operand.vmem [shape: f32[4,128], index: 1, kind: input, shape index: {}]   ;;  %s1590_s0 = inlined_call_operand.vmem [shape: f32[16,4], index: 0, kind: input, shape index: {}]   ;;  %s1591_s3 = inlined_call_operand.vmem [shape: f32[1,128], index: 3, kind: input, shape index: {}]   ;;  %s1592_s4 = inlined_call_operand.vmem [shape: f32[1,32], index: 4, kind: input, shape index: {}]   ;;  %s1593_s5 = inlined_call_operand.<no memory space> [shape: f32[1,1], index: 5, kind: input, shape index: {}]   ;;  %s1594_s6 = inlined_call_operand.vmem [shape: f32[2,1], index: 6, kind: output, shape index: {}]  }
   0x1   :  { %1154 = vmatprep.subr.bf16.mxu1 %v1354_v0  ;;  %v1399_v1 = vld [vmem:[%s1588_s2 + $0x8] sm:$0xff]   ;;  %1158 = vmatprep.mubr.msk.bf16.mxu1 %vm1355_vm2, %v1354_v0  ;;  %v28_v2 = vld [vmem:[%s1589_s1] sm:$0xf]  ;;  %v1356_v6 = vmov 0   ;;  %vm243_vm3 = vcmask 1041409   ;;  %vm138_vm4 = vcmask 261120  }
   0x2   :  { %v26_v3 = vld [vmem:[%s1590_s0] sm:$0xff]  ;;  %v27_v4 = vld [vmem:[%s1590_s0 + $0x8] sm:$0xff]  ;;  %1155 = vmatpush3.bf16.msra.mxu1 %v1399_v1  ;;  %1149 = vmatprep.subr.msk.mxu0 %vm43_vm0, %v28_v2  ;;  %vm1066_vm5 = vcmask 261127   ;;  %vm1070_vm6 = vcmask 253952   ;;  %vm1083_vm7 = vcmask 7175   ;;  %vm1085_vm8 = vcmask 0  }
   0x3   :  { %v1416_v5 = vld [vmem:[%s1588_s2] sm:$0xff]   ;;  %1150 = vmatpush3.msk.msra.mxu0 %vm43_vm0, %v28_v2  ;;  %1151 = vmatprep.mubr.msk.f32.mxu0 %vm36_vm1, %v26_v3  ;;  %s1357_s2 = smov 64  }
   0x4   :  { %1152 = vmatmul.mubr.msk.f32.vlgmr.msra.gmra.mxu0 %vm36_vm1, %v27_v4  ;;  %1156 = vmatprep.subr.bf16.mxu1 %v1354_v0  ;;  %v1091_v8 = vld [vmem:[%s1591_s3] ss:$0 sm:$0xff]  ;;  %s1358_s3 = smov 32  }
   0x5   :  { %1162 = vmatprep.subr.bf16.mxu0 %v1354_v0  ;;  %1166 = vmatprep.mubr.msk.bf16.mxu0 %vm1355_vm2, %v1354_v0 }
   0x6   :  { %1157 = vmatpush3.bf16.msra.mxu1 %v1416_v5  ;;  %1163 = vmatpush3.bf16.msra.mxu0 %v1399_v1 }
   0x7   :  { %1164 = vmatprep.subr.bf16.mxu0 %v1354_v0  ;;  %1170 = vmatprep.subr.bf16.mxu1 %v1354_v0 }
   0x9   :  { %1159 = vmatmul.mubr.bf16.vlgmr.msra.gmra.mxu1 %v1356_v6 }
   0xa   :  { %1165 = vmatpush3.bf16.msra.mxu0 %v1416_v5  ;;  %1171 = vmatpush3.bf16.msra.mxu1 %v1399_v1 }
   0xb   :  { %1172 = vmatprep.subr.bf16.mxu1 %v1354_v0  ;;  %1174 = vmatprep.mubr.msk.bf16.mxu1 %vm1355_vm2, %v1354_v0 }
   0xc   :  { %1178 = vmatprep.subr.bf16.mxu0 %v1354_v0 }
   0xe   :  { %1173 = vmatpush3.bf16.msra.mxu1 %v1416_v5 }
   0xf   :  { %1186 = vmatprep.subr.bf16.mxu1 %v1354_v0 }
  0xc4   :  { %v1153_v7 = vpop.f32.mrf.mxu0 }
  0xc5   :  { %v1437_v9 = vadd.f32 %v1153_v7, %v1091_v8 }
  0xc6   :  { %v113_v10 = vpop.f32.mrf.mxu0 }
  0xc7   :  { %v1439_v13 = vadd.f32 %v1091_v8, %v113_v10 }
  0xc9   :  { %v176_v11 = vpop.f32.mrf.mxu1 }
  0xca   :  { %v183_v12 = vrot.slane %v176_v11, 1  ;;  %v186_v17 = vadd.f32 %v176_v11, %v1439_v13 }
  0xcb   :  { %v1160_v14 = vpop.f32.mrf.mxu1 }
  0xcc   :  { %v187_v15 = vadd.f32 %v183_v12, %v1437_v9  ;;  %v1097_v22 = vmul.f32 -1.442695, %v186_v17 }
  0xcd   :  { %v179_v16 = vpop.f32.mrf.mxu1 }
  0xce   :  { %1226 = vtanh.f32 %v187_v15  ;;  %v1098_v21 = vmul.f32 -1.442695, %v187_v15 }
  0xcf   :  { %v1161_v18 = vpop.f32.mrf.mxu1  ;;  %1228 = vtanh.f32 %v186_v17 }
  0xd0   :  { %1230 = vpow2.f32 %v1098_v21 }
  0xd1   :  { %1232 = vpow2.f32 %v1097_v22 }
  0xdb   :  { %v1227_v19 = vpop.eup %1226 }
  0xdc   :  { %208 = vrot.lane.b32.xlu0 %v1227_v19, %s1357_s2  ;;  %v1229_v20 = vpop.eup %1228 }
  0xdd   :  { %v1231_v23 = vpop.eup %1230 }
  0xde   :  { %v195_v24 = vadd.f32 1.0, %v1231_v23  ;;  %v1233_v25 = vpop.eup %1232 }
  0xdf   :  { %v194_v26 = vadd.f32 1.0, %v1233_v25 }
  0xe0   :  { %206 = vrot.lane.b32.xlu0 %v1229_v20, %s1357_s2  ;;  %1234 = vrcp.f32 %v195_v24 }
  0xe1   :  { %1236 = vrcp.f32 %v194_v26 }
  0xed   :  { %v1235_v27 = vpop.eup %1234 }
  0xee   :  { %v1237_v30 = vpop.eup %1236  ;;  %v203_v33 = vmul.f32 0.0, %v1235_v27 }
  0xef   :  { %v202_v36 = vmul.f32 0.0, %v1237_v30 }
 0x14e   :  { %v209_v28 = vpop.permute.xlu0 %208 }
 0x14f   :  { %v213_v29 = vmul.f32 %v1235_v27, %v209_v28 }
 0x151   :  { %218 = vrot.lane.b32.xlu1 %v213_v29, %s1358_s3 }
 0x152   :  { %v207_v31 = vpop.permute.xlu0 %206 }
 0x153   :  { %v212_v32 = vmul.f32 %v1237_v30, %v207_v31 }
 0x155   :  { %216 = vrot.lane.b32.xlu1 %v212_v32, %s1358_s3 }
 0x1c3   :  { %v219_v34 = vpop.permute.xlu1 %218 }
 0x1c4   :  { %v1447_v35 = vadd.f32 %v219_v34, %v203_v33 }
 0x1c6   :  { %1238 = vtanh.f32 %v1447_v35  ;;  %v314_v15 = vrot.slane %v1447_v35, 7 }
 0x1c7   :  { %v217_v37 = vpop.permute.xlu1 %216 }
 0x1c8   :  { %v1450_v38 = vadd.f32 %v217_v37, %v202_v36 }
 0x1ca   :  { %1240 = vtanh.f32 %v1450_v38  ;;  %v313_v17 = vrot.slane %v1450_v38, 7 }
 0x1d3   :  { %v1239_v39 = vpop.eup %1238 }
 0x1d4   :  { %230 = vrot.lane.b32.xlu0 %v1239_v39, %s1357_s2 }
 0x1d7   :  { %v1241_v40 = vpop.eup %1240 }
 0x1d8   :  { %228 = vrot.lane.b32.xlu1 %v1241_v40, %s1357_s2 }
 0x246   :  { %v231_v41 = vpop.permute.xlu0 %230 }
 0x247   :  { %v235_v42 = vmul.f32 %v1235_v27, %v231_v41 }
 0x249   :  { %v237_v43 = vpack.c.bf16 %v235_v42, %v235_v42 }
 0x24a   :  { %v229_v44 = vpop.permute.xlu1 %228 }
 0x24b   :  { %v241_v45 = vunpack.c.l.b16 %v237_v43  ;;  %v234_v46 = vmul.f32 %v1237_v30, %v229_v44 }
 0x24d   :  { %v236_v47 = vpack.c.bf16 %v234_v46, %v234_v46  ;;  %v242_v48 = vrot.slane %v241_v45, 7 }
 0x24f   :  { %v240_v49 = vunpack.c.l.b16 %v236_v47 }
 0x251   :  { %v244_v50 = vsel %vm243_vm3, %v242_v48, %v240_v49 }
 0x252   :  { %v245_v51 = vpack.c.b16 %v244_v50, %v244_v50 }
 0x254   :  { %246 = vrot.lane.b32.xlu0 %v245_v51, %s1358_s3 }
 0x2c6   :  { %v247_v52 = vpop.permute.xlu0 %246 }
 0x2c7   :  { %1167 = vmatmul.mubr.msk.bf16.vlgmr.msra.gmra.mxu0 %vm138_vm4, %v247_v52 }
 0x2c8   :  { %1179 = vmatpush3.bf16.msra.mxu0 %v1399_v1  ;;  %1182 = vmatprep.mubr.msk.bf16.mxu0 %vm1355_vm2, %v1354_v0 }
 0x2c9   :  { %1180 = vmatprep.subr.bf16.mxu0 %v1354_v0 }
 0x2cc   :  { %1181 = vmatpush3.bf16.msra.mxu0 %v1416_v5 }
 0x2cd   :  { %1194 = vmatprep.subr.bf16.mxu0 %v1354_v0 }
 0x387   :  { %v285_v53 = vpop.f32.mrf.mxu0 }
 0x388   :  { %v292_v54 = vrot.slane %v285_v53, 7  ;;  %v296_v55 = vadd.f32 %v285_v53, %v1437_v9 }
 0x389   :  { %v1168_v56 = vpop.f32.mrf.mxu0 }
 0x38a   :  { %v295_v57 = vadd.f32 %v292_v54, %v1439_v13  ;;  %1242 = vtanh.f32 %v296_v55  ;;  %v1101_v62 = vmul.f32 -1.442695, %v296_v55 }
 0x38b   :  { %v288_v58 = vpop.f32.mrf.mxu0 }
 0x38c   :  { %1244 = vtanh.f32 %v295_v57  ;;  %v1100_v63 = vmul.f32 -1.442695, %v295_v57 }
 0x38d   :  { %v1169_v59 = vpop.f32.mrf.mxu0  ;;  %1246 = vpow2.f32 %v1101_v62 }
 0x38e   :  { %1248 = vpow2.f32 %v1100_v63 }
 0x397   :  { %v1243_v60 = vpop.eup %1242 }
 0x398   :  { %323 = vrot.lane.b32.xlu0 %v1243_v60, %s1357_s2 }
 0x399   :  { %v1245_v61 = vpop.eup %1244 }
 0x39a   :  { %321 = vrot.lane.b32.xlu1 %v1245_v61, %s1357_s2  ;;  %v1247_v2 = vpop.eup %1246 }
 0x39b   :  { %v1249_v3 = vpop.eup %1248  ;;  %v304_v4 = vadd.f32 1.0, %v1247_v2 }
 0x39c   :  { %v303_v6 = vadd.f32 1.0, %v1249_v3 }
 0x39d   :  { %1250 = vrcp.f32 %v304_v4 }
 0x39e   :  { %1252 = vrcp.f32 %v303_v6 }
 0x3aa   :  { %v1251_v7 = vpop.eup %1250 }
 0x3ab   :  { %v1253_v11 = vpop.eup %1252  ;;  %v318_v16 = vmul.f32 %v1251_v7, %v314_v15 }
 0x3ac   :  { %v317_v20 = vmul.f32 %v1253_v11, %v313_v17 }
 0x40a   :  { %v324_v8 = vpop.permute.xlu0 %323 }
 0x40b   :  { %v328_v10 = vmul.f32 %v1251_v7, %v324_v8 }
 0x40c   :  { %v322_v12 = vpop.permute.xlu1 %321 }
 0x40d   :  { %333 = vrot.lane.b32.xlu0 %v328_v10, %s1358_s3  ;;  %v327_v14 = vmul.f32 %v1253_v11, %v322_v12 }
 0x40f   :  { %331 = vrot.lane.b32.xlu1 %v327_v14, %s1358_s3 }
 0x47f   :  { %v334_v18 = vpop.permute.xlu0 %333 }
 0x480   :  { %v1472_v19 = vadd.f32 %v334_v18, %v318_v16 }
 0x481   :  { %v332_v21 = vpop.permute.xlu1 %331 }
 0x482   :  { %1254 = vtanh.f32 %v1472_v19  ;;  %v337_v22 = vadd.f32 %v332_v21, %v317_v20  ;;  %v429_v60 = vrot.slane %v1472_v19, 7 }
 0x484   :  { %1256 = vtanh.f32 %v337_v22  ;;  %v428_v59 = vrot.slane %v337_v22, 7 }
 0x48f   :  { %v1255_v23 = vpop.eup %1254 }
 0x490   :  { %345 = vrot.lane.b32.xlu0 %v1255_v23, %s1357_s2 }
 0x491   :  { %v1257_v24 = vpop.eup %1256 }
 0x492   :  { %343 = vrot.lane.b32.xlu1 %v1257_v24, %s1357_s2 }
 0x502   :  { %v346_v25 = vpop.permute.xlu0 %345 }
 0x503   :  { %v350_v26 = vmul.f32 %v1251_v7, %v346_v25 }
 0x504   :  { %v344_v27 = vpop.permute.xlu1 %343 }
 0x505   :  { %v349_v28 = vmul.f32 %v1253_v11, %v344_v27  ;;  %v352_v29 = vpack.c.bf16 %v350_v26, %v350_v26 }
 0x507   :  { %v351_v30 = vpack.c.bf16 %v349_v28, %v349_v28  ;;  %v356_v32 = vunpack.c.l.b16 %v352_v29 }
 0x509   :  { %v355_v31 = vunpack.c.l.b16 %v351_v30 }
 0x50b   :  { %v357_v33 = vrot.slane %v355_v31, 1 }
 0x50d   :  { %v358_v34 = vsel %vm243_vm3, %v356_v32, %v357_v33 }
 0x50e   :  { %v359_v35 = vpack.c.b16 %v358_v34, %v358_v34 }
 0x510   :  { %360 = vrot.lane.b32.xlu1 %v359_v35, %s1358_s3 }
 0x582   :  { %v361_v36 = vpop.permute.xlu1 %360 }
 0x583   :  { %1175 = vmatmul.mubr.msk.bf16.vlgmr.msra.gmra.mxu1 %vm138_vm4, %v361_v36 }
 0x584   :  { %1187 = vmatpush3.bf16.msra.mxu1 %v1399_v1  ;;  %1190 = vmatprep.mubr.msk.bf16.mxu1 %vm1355_vm2, %v1354_v0 }
 0x585   :  { %1188 = vmatprep.subr.bf16.mxu1 %v1354_v0 }
 0x588   :  { %1189 = vmatpush3.bf16.msra.mxu1 %v1416_v5 }
 0x589   :  { %1202 = vmatprep.subr.bf16.mxu1 %v1354_v0 }
 0x643   :  { %v399_v37 = vpop.f32.mrf.mxu1 }
 0x644   :  { %v406_v38 = vrot.slane %v399_v37, 6  ;;  %v407_v39 = vrot.slane %v399_v37, 7 }
 0x645   :  { %v1176_v40 = vpop.f32.mrf.mxu1 }
 0x646   :  { %v410_v41 = vadd.f32 %v406_v38, %v1439_v13  ;;  %v411_v42 = vadd.f32 %v407_v39, %v1437_v9 }
 0x647   :  { %v402_v43 = vpop.f32.mrf.mxu1 }
 0x648   :  { %1258 = vtanh.f32 %v410_v41  ;;  %v1103_v47 = vmul.f32 -1.442695, %v410_v41  ;;  %v1104_v48 = vmul.f32 -1.442695, %v411_v42 }
 0x649   :  { %1260 = vtanh.f32 %v411_v42  ;;  %v1177_v44 = vpop.f32.mrf.mxu1 }
 0x64a   :  { %1262 = vpow2.f32 %v1103_v47 }
 0x64b   :  { %1264 = vpow2.f32 %v1104_v48 }
 0x655   :  { %v1259_v45 = vpop.eup %1258 }
 0x656   :  { %v1261_v46 = vpop.eup %1260  ;;  %436 = vrot.lane.b32.xlu0 %v1259_v45, %s1357_s2 }
 0x657   :  { %438 = vrot.lane.b32.xlu1 %v1261_v46, %s1357_s2  ;;  %v1263_v49 = vpop.eup %1262 }
 0x658   :  { %v1265_v50 = vpop.eup %1264  ;;  %v418_v51 = vadd.f32 1.0, %v1263_v49 }
 0x659   :  { %v419_v52 = vadd.f32 1.0, %v1265_v50 }
 0x65a   :  { %1266 = vrcp.f32 %v418_v51 }
 0x65b   :  { %1268 = vrcp.f32 %v419_v52 }
 0x667   :  { %v1267_v53 = vpop.eup %1266 }
 0x668   :  { %v1269_v55 = vpop.eup %1268  ;;  %v432_v61 = vmul.f32 %v1267_v53, %v428_v59 }
 0x669   :  { %v433_v62 = vmul.f32 %v1269_v55, %v429_v60 }
 0x6c8   :  { %v437_v54 = vpop.permute.xlu0 %436 }
 0x6c9   :  { %v439_v56 = vpop.permute.xlu1 %438  ;;  %v442_v57 = vmul.f32 %v1267_v53, %v437_v54 }
 0x6ca   :  { %v443_v58 = vmul.f32 %v1269_v55, %v439_v56 }
 0x6cb   :  { %446 = vrot.lane.b32.xlu0 %v442_v57, %s1358_s3 }
 0x6cc   :  { %448 = vrot.lane.b32.xlu1 %v443_v58, %s1358_s3 }
 0x73d   :  { %v447_v63 = vpop.permute.xlu0 %446 }
 0x73e   :  { %v449_v2 = vpop.permute.xlu1 %448  ;;  %v1493_v3 = vadd.f32 %v447_v63, %v432_v61 }
 0x73f   :  { %v1495_v4 = vadd.f32 %v449_v2, %v433_v62 }
 0x740   :  { %1270 = vtanh.f32 %v1493_v3  ;;  %v544_v45 = vrot.slane %v1493_v3, 7 }
 0x741   :  { %1272 = vtanh.f32 %v1495_v4  ;;  %v545_v46 = vrot.slane %v1495_v4, 7 }
 0x74d   :  { %v1271_v6 = vpop.eup %1270 }
 0x74e   :  { %v1273_v7 = vpop.eup %1272  ;;  %458 = vrot.lane.b32.xlu0 %v1271_v6, %s1357_s2 }
 0x74f   :  { %460 = vrot.lane.b32.xlu1 %v1273_v7, %s1357_s2 }
 0x7c0   :  { %v459_v8 = vpop.permute.xlu0 %458 }
 0x7c1   :  { %v461_v10 = vpop.permute.xlu1 %460  ;;  %v464_v11 = vmul.f32 %v1267_v53, %v459_v8 }
 0x7c2   :  { %v465_v12 = vmul.f32 %v1269_v55, %v461_v10 }
 0x7c3   :  { %v466_v14 = vpack.c.bf16 %v464_v11, %v464_v11 }
 0x7c4   :  { %v467_v15 = vpack.c.bf16 %v465_v12, %v465_v12 }
 0x7c5   :  { %v470_v16 = vunpack.c.l.b16 %v466_v14 }
 0x7c6   :  { %v471_v17 = vunpack.c.l.b16 %v467_v15 }
 0x7c7   :  { %v472_v18 = vrot.slane %v470_v16, 2 }
 0x7c8   :  { %v473_v19 = vrot.slane %v471_v17, 1 }
 0x7ca   :  { %v474_v20 = vsel %vm243_vm3, %v473_v19, %v472_v18 }
 0x7cb   :  { %v475_v21 = vpack.c.b16 %v474_v20, %v474_v20 }
 0x7cd   :  { %476 = vrot.lane.b32.xlu0 %v475_v21, %s1358_s3 }
 0x83f   :  { %v477_v22 = vpop.permute.xlu0 %476 }
 0x840   :  { %1183 = vmatmul.mubr.msk.bf16.vlgmr.msra.gmra.mxu0 %vm138_vm4, %v477_v22 }
 0x841   :  { %1195 = vmatpush3.bf16.msra.mxu0 %v1399_v1  ;;  %1198 = vmatprep.mubr.msk.bf16.mxu0 %vm1355_vm2, %v1354_v0 }
 0x842   :  { %1196 = vmatprep.subr.bf16.mxu0 %v1354_v0 }
 0x845   :  { %1197 = vmatpush3.bf16.msra.mxu0 %v1416_v5 }
 0x846   :  { %1210 = vmatprep.subr.bf16.mxu0 %v1354_v0 }
 0x900   :  { %v515_v23 = vpop.f32.mrf.mxu0 }
 0x901   :  { %v522_v24 = vrot.slane %v515_v23, 5  ;;  %v523_v25 = vrot.slane %v515_v23, 6 }
 0x902   :  { %v1184_v26 = vpop.f32.mrf.mxu0 }
 0x903   :  { %v526_v27 = vadd.f32 %v522_v24, %v1439_v13  ;;  %v527_v28 = vadd.f32 %v523_v25, %v1437_v9 }
 0x904   :  { %v518_v29 = vpop.f32.mrf.mxu0 }
 0x905   :  { %1274 = vtanh.f32 %v526_v27  ;;  %v1106_v33 = vmul.f32 -1.442695, %v526_v27  ;;  %v1107_v34 = vmul.f32 -1.442695, %v527_v28 }
 0x906   :  { %1276 = vtanh.f32 %v527_v28  ;;  %v1185_v30 = vpop.f32.mrf.mxu0 }
 0x907   :  { %1278 = vpow2.f32 %v1106_v33 }
 0x908   :  { %1280 = vpow2.f32 %v1107_v34 }
 0x912   :  { %v1275_v31 = vpop.eup %1274 }
 0x913   :  { %v1277_v32 = vpop.eup %1276  ;;  %552 = vrot.lane.b32.xlu1 %v1275_v31, %s1357_s2 }
 0x914   :  { %554 = vrot.lane.b32.xlu0 %v1277_v32, %s1357_s2  ;;  %v1279_v35 = vpop.eup %1278 }
 0x915   :  { %v1281_v36 = vpop.eup %1280  ;;  %v534_v37 = vadd.f32 1.0, %v1279_v35 }
 0x916   :  { %v535_v38 = vadd.f32 1.0, %v1281_v36 }
 0x917   :  { %1282 = vrcp.f32 %v534_v37 }
 0x918   :  { %1284 = vrcp.f32 %v535_v38 }
 0x924   :  { %v1283_v39 = vpop.eup %1282 }
 0x925   :  { %v1285_v41 = vpop.eup %1284  ;;  %v548_v47 = vmul.f32 %v1283_v39, %v544_v45 }
 0x926   :  { %v549_v48 = vmul.f32 %v1285_v41, %v545_v46 }
 0x985   :  { %v553_v40 = vpop.permute.xlu1 %552 }
 0x986   :  { %v555_v42 = vpop.permute.xlu0 %554  ;;  %v558_v43 = vmul.f32 %v1283_v39, %v553_v40 }
 0x987   :  { %v559_v44 = vmul.f32 %v1285_v41, %v555_v42 }
 0x988   :  { %562 = vrot.lane.b32.xlu1 %v558_v43, %s1358_s3 }
 0x989   :  { %564 = vrot.lane.b32.xlu0 %v559_v44, %s1358_s3 }
 0x9fa   :  { %v563_v49 = vpop.permute.xlu1 %562 }
 0x9fb   :  { %v565_v50 = vpop.permute.xlu0 %564  ;;  %v568_v51 = vadd.f32 %v563_v49, %v548_v47 }
 0x9fc   :  { %v569_v52 = vadd.f32 %v565_v50, %v549_v48 }
 0x9fd   :  { %1286 = vtanh.f32 %v568_v51  ;;  %v660_v31 = vrot.slane %v568_v51, 7 }
 0x9fe   :  { %1288 = vtanh.f32 %v569_v52  ;;  %v661_v32 = vrot.slane %v569_v52, 7 }
 0xa0a   :  { %v1287_v53 = vpop.eup %1286 }
 0xa0b   :  { %v1289_v54 = vpop.eup %1288  ;;  %574 = vrot.lane.b32.xlu1 %v1287_v53, %s1357_s2 }
 0xa0c   :  { %576 = vrot.lane.b32.xlu0 %v1289_v54, %s1357_s2 }
 0xa7d   :  { %v575_v55 = vpop.permute.xlu1 %574 }
 0xa7e   :  { %v577_v56 = vpop.permute.xlu0 %576  ;;  %v580_v57 = vmul.f32 %v1283_v39, %v575_v55 }
 0xa7f   :  { %v581_v58 = vmul.f32 %v1285_v41, %v577_v56 }
 0xa80   :  { %v582_v59 = vpack.c.bf16 %v580_v57, %v580_v57 }
 0xa81   :  { %v583_v60 = vpack.c.bf16 %v581_v58, %v581_v58 }
 0xa82   :  { %v586_v61 = vunpack.c.l.b16 %v582_v59 }
 0xa83   :  { %v587_v62 = vunpack.c.l.b16 %v583_v60 }
 0xa84   :  { %v588_v63 = vrot.slane %v586_v61, 3 }
 0xa85   :  { %v589_v2 = vrot.slane %v587_v62, 2 }
 0xa87   :  { %v590_v3 = vsel %vm243_vm3, %v589_v2, %v588_v63 }
 0xa88   :  { %v591_v4 = vpack.c.b16 %v590_v3, %v590_v3 }
 0xa8a   :  { %592 = vrot.lane.b32.xlu1 %v591_v4, %s1358_s3 }
 0xafc   :  { %v593_v6 = vpop.permute.xlu1 %592 }
 0xafd   :  { %1191 = vmatmul.mubr.msk.bf16.vlgmr.msra.gmra.mxu1 %vm138_vm4, %v593_v6 }
 0xafe   :  { %1203 = vmatpush3.bf16.msra.mxu1 %v1399_v1  ;;  %1206 = vmatprep.mubr.msk.bf16.mxu1 %vm1355_vm2, %v1354_v0 }
 0xaff   :  { %1204 = vmatprep.subr.bf16.mxu1 %v1354_v0 }
 0xb02   :  { %1205 = vmatpush3.bf16.msra.mxu1 %v1416_v5 }
 0xbbd   :  { %v631_v7 = vpop.f32.mrf.mxu1 }
 0xbbe   :  { %v638_v8 = vrot.slane %v631_v7, 4  ;;  %v639_v10 = vrot.slane %v631_v7, 5 }
 0xbbf   :  { %v1192_v11 = vpop.f32.mrf.mxu1 }
 0xbc0   :  { %v642_v12 = vadd.f32 %v638_v8, %v1439_v13  ;;  %v643_v14 = vadd.f32 %v639_v10, %v1437_v9 }
 0xbc1   :  { %v634_v15 = vpop.f32.mrf.mxu1 }
 0xbc2   :  { %1290 = vtanh.f32 %v642_v12  ;;  %v1109_v19 = vmul.f32 -1.442695, %v642_v12  ;;  %v1110_v20 = vmul.f32 -1.442695, %v643_v14 }
 0xbc3   :  { %1292 = vtanh.f32 %v643_v14  ;;  %v1193_v16 = vpop.f32.mrf.mxu1 }
 0xbc4   :  { %1294 = vpow2.f32 %v1109_v19 }
 0xbc5   :  { %1296 = vpow2.f32 %v1110_v20 }
 0xbcf   :  { %v1291_v17 = vpop.eup %1290 }
 0xbd0   :  { %v1293_v18 = vpop.eup %1292  ;;  %668 = vrot.lane.b32.xlu0 %v1291_v17, %s1357_s2 }
 0xbd1   :  { %670 = vrot.lane.b32.xlu1 %v1293_v18, %s1357_s2  ;;  %v1295_v21 = vpop.eup %1294 }
 0xbd2   :  { %v1297_v22 = vpop.eup %1296  ;;  %v650_v23 = vadd.f32 1.0, %v1295_v21 }
 0xbd3   :  { %v651_v24 = vadd.f32 1.0, %v1297_v22 }
 0xbd4   :  { %1298 = vrcp.f32 %v650_v23 }
 0xbd5   :  { %1300 = vrcp.f32 %v651_v24 }
 0xbe1   :  { %v1299_v25 = vpop.eup %1298 }
 0xbe2   :  { %v1301_v27 = vpop.eup %1300  ;;  %v664_v33 = vmul.f32 %v1299_v25, %v660_v31 }
 0xbe3   :  { %v665_v34 = vmul.f32 %v1301_v27, %v661_v32 }
 0xc42   :  { %v669_v26 = vpop.permute.xlu0 %668 }
 0xc43   :  { %v671_v28 = vpop.permute.xlu1 %670  ;;  %v674_v29 = vmul.f32 %v1299_v25, %v669_v26 }
 0xc44   :  { %v675_v30 = vmul.f32 %v1301_v27, %v671_v28 }
 0xc45   :  { %678 = vrot.lane.b32.xlu0 %v674_v29, %s1358_s3 }
 0xc46   :  { %680 = vrot.lane.b32.xlu1 %v675_v30, %s1358_s3 }
 0xcb7   :  { %v679_v35 = vpop.permute.xlu0 %678 }
 0xcb8   :  { %v681_v36 = vpop.permute.xlu1 %680  ;;  %v684_v37 = vadd.f32 %v679_v35, %v664_v33 }
 0xcb9   :  { %v685_v38 = vadd.f32 %v681_v36, %v665_v34 }
 0xcba   :  { %1302 = vtanh.f32 %v684_v37  ;;  %v776_v14 = vrot.slane %v684_v37, 7 }
 0xcbb   :  { %1304 = vtanh.f32 %v685_v38  ;;  %v777_v15 = vrot.slane %v685_v38, 7 }
 0xcc7   :  { %v1303_v39 = vpop.eup %1302 }
 0xcc8   :  { %v1305_v40 = vpop.eup %1304  ;;  %690 = vrot.lane.b32.xlu0 %v1303_v39, %s1357_s2 }
 0xcc9   :  { %692 = vrot.lane.b32.xlu1 %v1305_v40, %s1357_s2 }
 0xd3a   :  { %v691_v41 = vpop.permute.xlu0 %690 }
 0xd3b   :  { %v693_v42 = vpop.permute.xlu1 %692  ;;  %v696_v43 = vmul.f32 %v1299_v25, %v691_v41 }
 0xd3c   :  { %v697_v44 = vmul.f32 %v1301_v27, %v693_v42 }
 0xd3d   :  { %v698_v45 = vpack.c.bf16 %v696_v43, %v696_v43 }
 0xd3e   :  { %v699_v46 = vpack.c.bf16 %v697_v44, %v697_v44 }
 0xd3f   :  { %v702_v47 = vunpack.c.l.b16 %v698_v45 }
 0xd40   :  { %v703_v48 = vunpack.c.l.b16 %v699_v46 }
 0xd41   :  { %v704_v49 = vrot.slane %v702_v47, 4 }
 0xd42   :  { %v705_v50 = vrot.slane %v703_v48, 3 }
 0xd44   :  { %v706_v51 = vsel %vm243_vm3, %v705_v50, %v704_v49 }
 0xd45   :  { %v707_v52 = vpack.c.b16 %v706_v51, %v706_v51 }
 0xd47   :  { %708 = vrot.lane.b32.xlu0 %v707_v52, %s1358_s3 }
 0xdb9   :  { %v709_v53 = vpop.permute.xlu0 %708 }
 0xdba   :  { %1199 = vmatmul.mubr.msk.bf16.vlgmr.msra.gmra.mxu0 %vm138_vm4, %v709_v53 }
 0xdbb   :  { %1211 = vmatpush3.bf16.msra.mxu0 %v1399_v1  ;;  %1214 = vmatprep.mubr.msk.bf16.mxu0 %vm1355_vm2, %v1354_v0 }
 0xdbc   :  { %1212 = vmatprep.subr.bf16.mxu0 %v1354_v0 }
 0xdbf   :  { %1213 = vmatpush3.bf16.msra.mxu0 %v1416_v5 }
 0xe7a   :  { %v747_v54 = vpop.f32.mrf.mxu0 }
 0xe7b   :  { %v754_v55 = vrot.slane %v747_v54, 3  ;;  %v755_v56 = vrot.slane %v747_v54, 4 }
 0xe7c   :  { %v1200_v57 = vpop.f32.mrf.mxu0 }
 0xe7d   :  { %v758_v58 = vadd.f32 %v754_v55, %v1439_v13  ;;  %v759_v59 = vadd.f32 %v755_v56, %v1437_v9 }
 0xe7e   :  { %v750_v60 = vpop.f32.mrf.mxu0 }
 0xe7f   :  { %1306 = vtanh.f32 %v758_v58  ;;  %v1112_v0 = vmul.f32 -1.442695, %v758_v58  ;;  %v1113_v5 = vmul.f32 -1.442695, %v759_v59 }
 0xe80   :  { %1308 = vtanh.f32 %v759_v59  ;;  %v1201_v61 = vpop.f32.mrf.mxu0 }
 0xe81   :  { %1310 = vpow2.f32 %v1112_v0 }
 0xe82   :  { %1312 = vpow2.f32 %v1113_v5 }
 0xe8c   :  { %v1307_v1 = vpop.eup %1306 }
 0xe8d   :  { %v1309_v62 = vpop.eup %1308  ;;  %784 = vrot.lane.b32.xlu1 %v1307_v1, %s1357_s2 }
 0xe8e   :  { %786 = vrot.lane.b32.xlu0 %v1309_v62, %s1357_s2  ;;  %v1311_v63 = vpop.eup %1310 }
 0xe8f   :  { %v1313_v2 = vpop.eup %1312  ;;  %v766_v3 = vadd.f32 1.0, %v1311_v63 }
 0xe90   :  { %v767_v4 = vadd.f32 1.0, %v1313_v2 }
 0xe91   :  { %1314 = vrcp.f32 %v766_v3 }
 0xe92   :  { %1316 = vrcp.f32 %v767_v4 }
 0xe9e   :  { %v1315_v6 = vpop.eup %1314 }
 0xe9f   :  { %v1317_v8 = vpop.eup %1316  ;;  %v780_v16 = vmul.f32 %v1315_v6, %v776_v14 }
 0xea0   :  { %v781_v17 = vmul.f32 %v1317_v8, %v777_v15 }
 0xeff   :  { %v785_v7 = vpop.permute.xlu1 %784 }
 0xf00   :  { %v787_v10 = vpop.permute.xlu0 %786  ;;  %v790_v11 = vmul.f32 %v1315_v6, %v785_v7 }
 0xf01   :  { %v791_v12 = vmul.f32 %v1317_v8, %v787_v10 }
 0xf02   :  { %794 = vrot.lane.b32.xlu1 %v790_v11, %s1358_s3 }
 0xf03   :  { %796 = vrot.lane.b32.xlu0 %v791_v12, %s1358_s3 }
 0xf74   :  { %v795_v18 = vpop.permute.xlu1 %794 }
 0xf75   :  { %v797_v19 = vpop.permute.xlu0 %796  ;;  %v800_v20 = vadd.f32 %v795_v18, %v780_v16 }
 0xf76   :  { %v801_v21 = vadd.f32 %v797_v19, %v781_v17 }
 0xf77   :  { %1318 = vtanh.f32 %v800_v20  ;;  %v892_v59 = vrot.slane %v800_v20, 7 }
 0xf78   :  { %1320 = vtanh.f32 %v801_v21  ;;  %v893_v60 = vrot.slane %v801_v21, 7 }
 0xf84   :  { %v1319_v22 = vpop.eup %1318 }
 0xf85   :  { %v1321_v23 = vpop.eup %1320  ;;  %806 = vrot.lane.b32.xlu1 %v1319_v22, %s1357_s2 }
 0xf86   :  { %808 = vrot.lane.b32.xlu0 %v1321_v23, %s1357_s2 }
 0xff7   :  { %v807_v24 = vpop.permute.xlu1 %806 }
 0xff8   :  { %v809_v25 = vpop.permute.xlu0 %808  ;;  %v812_v26 = vmul.f32 %v1315_v6, %v807_v24 }
 0xff9   :  { %v813_v27 = vmul.f32 %v1317_v8, %v809_v25 }
 0xffa   :  { %v814_v28 = vpack.c.bf16 %v812_v26, %v812_v26 }
 0xffb   :  { %v815_v29 = vpack.c.bf16 %v813_v27, %v813_v27 }
 0xffc   :  { %v818_v30 = vunpack.c.l.b16 %v814_v28 }
 0xffd   :  { %v819_v31 = vunpack.c.l.b16 %v815_v29 }
 0xffe   :  { %v820_v32 = vrot.slane %v818_v30, 5 }
 0xfff   :  { %v821_v33 = vrot.slane %v819_v31, 4 }
0x1001   :  { %v822_v34 = vsel %vm243_vm3, %v821_v33, %v820_v32 }
0x1002   :  { %v823_v35 = vpack.c.b16 %v822_v34, %v822_v34 }
0x1004   :  { %824 = vrot.lane.b32.xlu1 %v823_v35, %s1358_s3 }
0x1076   :  { %v825_v36 = vpop.permute.xlu1 %824 }
0x1077   :  { %1207 = vmatmul.mubr.msk.bf16.vlgmr.msra.gmra.mxu1 %vm138_vm4, %v825_v36 }
0x1137   :  { %v863_v37 = vpop.f32.mrf.mxu1 }
0x1138   :  { %v870_v38 = vrot.slane %v863_v37, 2  ;;  %v871_v39 = vrot.slane %v863_v37, 3 }
0x1139   :  { %v1208_v40 = vpop.f32.mrf.mxu1 }
0x113a   :  { %v874_v41 = vadd.f32 %v870_v38, %v1439_v13  ;;  %v875_v42 = vadd.f32 %v871_v39, %v1437_v9 }
0x113b   :  { %v866_v43 = vpop.f32.mrf.mxu1 }
0x113c   :  { %1322 = vtanh.f32 %v874_v41  ;;  %v1115_v47 = vmul.f32 -1.442695, %v874_v41  ;;  %v1116_v48 = vmul.f32 -1.442695, %v875_v42 }
0x113d   :  { %1324 = vtanh.f32 %v875_v42  ;;  %v1209_v44 = vpop.f32.mrf.mxu1 }
0x113e   :  { %1326 = vpow2.f32 %v1115_v47 }
0x113f   :  { %1328 = vpow2.f32 %v1116_v48 }
0x1149   :  { %v1323_v45 = vpop.eup %1322 }
0x114a   :  { %v1325_v46 = vpop.eup %1324  ;;  %900 = vrot.lane.b32.xlu0 %v1323_v45, %s1357_s2 }
0x114b   :  { %902 = vrot.lane.b32.xlu1 %v1325_v46, %s1357_s2  ;;  %v1327_v49 = vpop.eup %1326 }
0x114c   :  { %v1329_v50 = vpop.eup %1328  ;;  %v882_v51 = vadd.f32 1.0, %v1327_v49 }
0x114d   :  { %v883_v52 = vadd.f32 1.0, %v1329_v50  ;;  %v1120_v50 = vld [vmem:[%s1592_s4] ss:$0 sm:$0xff] }
0x114e   :  { %1330 = vrcp.f32 %v882_v51  ;;  %v11_v51 = vstv %s1593_s5 }
0x114f   :  { %1332 = vrcp.f32 %v883_v52  ;;  %12 = vst [vmem:[#allocation2] sm:$0x1] %v11_v51 }
0x115b   :  { %v1331_v53 = vpop.eup %1330 }
0x115c   :  { %v1333_v55 = vpop.eup %1332  ;;  %v896_v61 = vmul.f32 %v1331_v53, %v892_v59 }
0x115d   :  { %v897_v1 = vmul.f32 %v1333_v55, %v893_v60 }
0x11bc   :  { %v901_v54 = vpop.permute.xlu0 %900 }
0x11bd   :  { %v903_v56 = vpop.permute.xlu1 %902  ;;  %v906_v57 = vmul.f32 %v1331_v53, %v901_v54 }
0x11be   :  { %v907_v58 = vmul.f32 %v1333_v55, %v903_v56 }
0x11bf   :  { %910 = vrot.lane.b32.xlu0 %v906_v57, %s1358_s3 }
0x11c0   :  { %912 = vrot.lane.b32.xlu1 %v907_v58, %s1358_s3 }
0x1231   :  { %v911_v62 = vpop.permute.xlu0 %910 }
0x1232   :  { %v913_v0 = vpop.permute.xlu1 %912  ;;  %v916_v5 = vadd.f32 %v911_v62, %v896_v61 }
0x1233   :  { %v917_v63 = vadd.f32 %v913_v0, %v897_v1  ;;  %v1121_v0 = vld [vmem:[#allocation2] ss:$0 sm:$0xff] }
0x1234   :  { %1334 = vtanh.f32 %v916_v5  ;;  %v1008_v40 = vrot.slane %v916_v5, 7 }
0x1235   :  { %1336 = vtanh.f32 %v917_v63  ;;  %v1009_v41 = vrot.slane %v917_v63, 7 }
0x1241   :  { %v1335_v2 = vpop.eup %1334 }
0x1242   :  { %v1337_v3 = vpop.eup %1336  ;;  %922 = vrot.lane.b32.xlu0 %v1335_v2, %s1357_s2 }
0x1243   :  { %924 = vrot.lane.b32.xlu1 %v1337_v3, %s1357_s2 }
0x12b4   :  { %v923_v4 = vpop.permute.xlu0 %922 }
0x12b5   :  { %v925_v6 = vpop.permute.xlu1 %924  ;;  %v928_v7 = vmul.f32 %v1331_v53, %v923_v4 }
0x12b6   :  { %v929_v8 = vmul.f32 %v1333_v55, %v925_v6 }
0x12b7   :  { %v930_v10 = vpack.c.bf16 %v928_v7, %v928_v7 }
0x12b8   :  { %v931_v11 = vpack.c.bf16 %v929_v8, %v929_v8 }
0x12b9   :  { %v934_v12 = vunpack.c.l.b16 %v930_v10 }
0x12ba   :  { %v935_v14 = vunpack.c.l.b16 %v931_v11 }
0x12bb   :  { %v936_v15 = vrot.slane %v934_v12, 6 }
0x12bc   :  { %v937_v16 = vrot.slane %v935_v14, 5 }
0x12be   :  { %v938_v17 = vsel %vm243_vm3, %v937_v16, %v936_v15 }
0x12bf   :  { %v939_v18 = vpack.c.b16 %v938_v17, %v938_v17 }
0x12c1   :  { %940 = vrot.lane.b32.xlu0 %v939_v18, %s1358_s3 }
0x1333   :  { %v941_v19 = vpop.permute.xlu0 %940 }
0x1334   :  { %1215 = vmatmul.mubr.msk.bf16.vlgmr.msra.gmra.mxu0 %vm138_vm4, %v941_v19 }
0x13f4   :  { %v979_v20 = vpop.f32.mrf.mxu0 }
0x13f5   :  { %v986_v21 = vrot.slane %v979_v20, 1  ;;  %v987_v22 = vrot.slane %v979_v20, 2 }
0x13f6   :  { %v1216_v23 = vpop.f32.mrf.mxu0 }
0x13f7   :  { %v990_v24 = vadd.f32 %v986_v21, %v1439_v13  ;;  %v991_v25 = vadd.f32 %v987_v22, %v1437_v9 }
0x13f8   :  { %v982_v26 = vpop.f32.mrf.mxu0 }
0x13f9   :  { %1338 = vtanh.f32 %v990_v24  ;;  %v1118_v30 = vmul.f32 -1.442695, %v990_v24  ;;  %v1119_v31 = vmul.f32 -1.442695, %v991_v25 }
0x13fa   :  { %1340 = vtanh.f32 %v991_v25  ;;  %v1217_v27 = vpop.f32.mrf.mxu0 }
0x13fb   :  { %1342 = vpow2.f32 %v1118_v30 }
0x13fc   :  { %1344 = vpow2.f32 %v1119_v31 }
0x1406   :  { %v1339_v28 = vpop.eup %1338 }
0x1407   :  { %v1341_v29 = vpop.eup %1340  ;;  %1016 = vrot.lane.b32.xlu0 %v1339_v28, %s1357_s2 }
0x1408   :  { %1018 = vrot.lane.b32.xlu1 %v1341_v29, %s1357_s2  ;;  %v1343_v32 = vpop.eup %1342 }
0x1409   :  { %v1345_v33 = vpop.eup %1344  ;;  %v998_v34 = vadd.f32 1.0, %v1343_v32 }
0x140a   :  { %v999_v13 = vadd.f32 1.0, %v1345_v33 }
0x140b   :  { %1346 = vrcp.f32 %v998_v34 }
0x140c   :  { %1348 = vrcp.f32 %v999_v13 }
0x1418   :  { %v1347_v9 = vpop.eup %1346 }
0x1419   :  { %v1349_v36 = vpop.eup %1348  ;;  %v1012_v42 = vmul.f32 %v1347_v9, %v1008_v40 }
0x141a   :  { %v1013_v43 = vmul.f32 %v1349_v36, %v1009_v41 }
0x1479   :  { %v1017_v35 = vpop.permute.xlu0 %1016 }
0x147a   :  { %v1019_v37 = vpop.permute.xlu1 %1018  ;;  %v1022_v38 = vmul.f32 %v1347_v9, %v1017_v35 }
0x147b   :  { %v1023_v39 = vmul.f32 %v1349_v36, %v1019_v37 }
0x147c   :  { %1026 = vrot.lane.b32.xlu0 %v1022_v38, %s1358_s3 }
0x147d   :  { %1028 = vrot.lane.b32.xlu1 %v1023_v39, %s1358_s3 }
0x14ee   :  { %v1027_v44 = vpop.permute.xlu0 %1026 }
0x14ef   :  { %v1029_v45 = vpop.permute.xlu1 %1028  ;;  %v1032_v46 = vadd.f32 %v1027_v44, %v1012_v42 }
0x14f0   :  { %v1033_v47 = vadd.f32 %v1029_v45, %v1013_v43 }
0x14f1   :  { %1350 = vtanh.f32 %v1032_v46 }
0x14f2   :  { %1352 = vtanh.f32 %v1033_v47 }
0x14fe   :  { %v1351_v48 = vpop.eup %1350 }
0x14ff   :  { %v1353_v49 = vpop.eup %1352  ;;  %1038 = vrot.lane.b32.xlu0 %v1351_v48, %s1357_s2 }
0x1500   :  { %1040 = vrot.lane.b32.xlu1 %v1353_v49, %s1357_s2 }
0x1504   :  { %1052 = vrot.lane.b32.xlu1 %v1120_v50, %s1359_s9 }
0x1571   :  { %v1039_v53 = vpop.permute.xlu0 %1038 }
0x1572   :  { %v1041_v52 = vpop.permute.xlu1 %1040  ;;  %v1044_v55 = vmul.f32 %v1347_v9, %v1039_v53 }
0x1573   :  { %v1045_v54 = vmul.f32 %v1349_v36, %v1041_v52 }
0x1576   :  { %v1053_v56 = vpop.permute.xlu1 %1052 }
0x1577   :  { %v1055_v57 = vmul.f32 %v1053_v56, %v1044_v55  ;;  %v1056_v58 = vmul.f32 %v1053_v56, %v1045_v54 }
0x1579   :  { %v1059_v59 = vrot.slane %v1056_v58, 7  ;;  %1060 = vrot.lane.b32.xlu0 %v1055_v57, %s1358_s3 }
0x157b   :  { %1062 = vrot.lane.b32.xlu1 %v1059_v59, %s1358_s3 }
0x15eb   :  { %v1061_v60 = vpop.permute.xlu0 %1060 }
0x15ec   :  { %v1067_v61 = vsel %vm1066_vm5, %v1061_v60, 0.0 }
0x15ed   :  { %v1063_v1 = vpop.permute.xlu1 %1062  ;;  %1068 = vadd.xlane.f32.xlu0 %v1067_v61 }
0x15ee   :  { %v1071_v62 = vsel %vm1070_vm6, %v1063_v1, 0.0 }
0x15ef   :  { %1072 = vadd.xlane.f32.xlu1 %v1071_v62 }
0x1676   :  { %v1069_v5 = vpop.xlane.xlu0 %1068 }
0x1677   :  { %v1081_v63 = vadd.f32 %v1121_v0, %v1069_v5 }
0x1678   :  { %v1073_v2 = vpop.xlane.xlu1 %1072 }
0x1679   :  { %1084 = vst.msk [vmem:[%s1594_s6 - $0x7] sm:$0x80] %vm1083_vm7, %v1081_v63  ;;  %v1082_v3 = vadd.f32 %v1121_v0, %v1073_v2 }
0x167b   :  { %1086 = vst.msk [vmem:[%s1594_s6 + $0x1] sm:$0x1] %vm1085_vm8, %v1082_v3 }

</bundles_post_ra>
